<compile_context>
chip_gen: v5e
topology: v5e:2x2
jax: 0.10.0
libtpu: 0.0.40
codegen_flags: <defaults>
</compile_context>

<pallas_src>
import functools

import jax
import jax.numpy as jnp
from jax.experimental import pallas as pl
from jax.experimental.pallas import tpu as pltpu

_LANE = 128
_SUBLANE = 8


def _round_up(a, b):
    return (a + b - 1) // b * b


def _wbce_kernel(ab_ref, x_ref, t_ref, *rest,
                 has_weight, rows_per_block, total, need_mask):
    """One grid step == one (rows_per_block, 128) slab of flattened elements.

    ab_ref : (2,)                SMEM  [alpha, beta]
    x_ref  : (rows_per_block,128) VMEM logits
    t_ref  : (rows_per_block,128) VMEM targets
    w_ref  : (rows_per_block,128) VMEM weights   (only if has_weight)
    out_ref: (1, 1, 1)            VMEM per-block partial sum
    """
    if has_weight:
        w_ref, out_ref = rest
    else:
        (out_ref,) = rest
        w_ref = None

    x = x_ref[...]
    t = t_ref[...]

    # Numerically-stable BCE-with-logits, exactly as in the PyTorch module.
    max_val = jnp.maximum(-x, 0.0)
    loss = x - x * t + max_val + jnp.log(
        jnp.exp(-max_val) + jnp.exp(-x - max_val))

    if has_weight:
        alpha = ab_ref[0]
        beta = ab_ref[1]
        loss = alpha * loss + beta * loss * w_ref[...]

    if need_mask:
        # Zero out zero-padded tail elements so they don't pollute the sum.
        b = pl.program_id(0)
        row_ids = jax.lax.broadcasted_iota(jnp.int32, loss.shape, 0)
        col_ids = jax.lax.broadcasted_iota(jnp.int32, loss.shape, 1)
        flat_idx = (b * rows_per_block + row_ids) * _LANE + col_ids
        loss = jnp.where(flat_idx < total, loss, 0.0)

    # Per-block partial sum; the tiny cross-block reduction happens outside.
    out_ref[...] = jnp.sum(loss, keepdims=True).reshape(1, 1, 1)


def weighted_bce_with_logits_loss(inp, target, weight=None,
                                  alpha=1.0, beta=1.0,
                                  size_average=True,
                                  max_block_rows=4096):
    """Pallas implementation of WeightedBCEWithLogitsLoss.forward."""
    if target.shape != inp.shape:
        raise ValueError(
            "Target size ({}) must be the same as input size ({})".format(
                target.shape, inp.shape))
    if weight is not None and weight.shape != inp.shape:
        raise ValueError("weight must have the same shape as input")

    total = int(inp.size)
    total_rows = pl.cdiv(total, _LANE)
    rows_per_block = min(int(max_block_rows), _round_up(total_rows, _SUBLANE))
    padded_rows = _round_up(total_rows, rows_per_block)
    num_blocks = padded_rows // rows_per_block
    padded_total = padded_rows * _LANE
    need_mask = padded_total != total

    def to_2d(a):
        flat = a.reshape(-1).astype(jnp.float32)
        if need_mask:
            flat = jnp.pad(flat, (0, padded_total - total))
        return flat.reshape(padded_rows, _LANE)

    has_weight = weight is not None
    ab = jnp.array([alpha, beta], dtype=jnp.float32)

    args = [ab, to_2d(inp), to_2d(target)]
    data_spec = pl.BlockSpec((rows_per_block, _LANE), lambda b: (b, 0))
    in_specs = [
        pl.BlockSpec(memory_space=pltpu.SMEM),   # alpha/beta scalars
        data_spec,                               # input
        data_spec,                               # target
    ]
    if has_weight:
        args.append(to_2d(weight))
        in_specs.append(data_spec)               # weight

    kernel = functools.partial(
        _wbce_kernel,
        has_weight=has_weight,
        rows_per_block=rows_per_block,
        total=total,
        need_mask=need_mask,
    )

    partials = pl.pallas_call(
        kernel,
        out_shape=jax.ShapeDtypeStruct((num_blocks, 1, 1), jnp.float32),
        grid_spec=pltpu.PrefetchScalarGridSpec(
            num_scalar_prefetch=0,
            grid=(num_blocks,),
            in_specs=in_specs,
            # Per-block partial sums: disjoint, lane/sublane-aligned VMEM
            # blocks -> safe to run the grid axis in parallel on v7x megacore.
            out_specs=pl.BlockSpec((1, 1, 1), lambda b: (b, 0, 0)),
        ),
        compiler_params=pltpu.CompilerParams(
            dimension_semantics=("parallel",),
        ),
    )(*args)

    total_sum = jnp.sum(partials)
    if size_average:
        return total_sum / jnp.float32(total)
    return total_sum


class WeightedBCEWithLogitsLoss:
    """Thin module-like wrapper mirroring the PyTorch class."""

    def __init__(self, size_average=True):
        self.size_average = size_average

    def __call__(self, inp, target, weight, alpha, beta):
        return weighted_bce_with_logits_loss(
            inp, target, weight, alpha, beta, size_average=self.size_average)


def _reference(inp, target, weight, alpha, beta, size_average=True):
    """Pure-JAX reference matching the PyTorch module."""
    max_val = jnp.maximum(-inp, 0.0)
    loss = inp - inp * target + max_val + jnp.log(
        jnp.exp(-max_val) + jnp.exp(-inp - max_val))
    if weight is not None:
        loss = alpha * loss + beta * loss * weight
    return jnp.mean(loss) if size_average else jnp.sum(loss)


if __name__ == "__main__":
    key = jax.random.PRNGKey(0)
    k1, k2, k3, k4, k5, k6 = jax.random.split(key, 6)

    # --- test 1: weighted, mean reduction, (B, C, H, W) = (2, 4, 16, 16) ---
    shape = (2, 4, 16, 16)
    logits = jax.random.normal(k1, shape, dtype=jnp.float32)
    target = (jax.random.uniform(k2, shape) > 0.5).astype(jnp.float32)
    weight = jax.random.uniform(k3, shape, dtype=jnp.float32) * 2.0
    alpha, beta = 0.7, 0.3

    loss_fn = WeightedBCEWithLogitsLoss(size_average=True)
    out = loss_fn(logits, target, weight, alpha, beta)
    jax.block_until_ready(out)
    ref = _reference(logits, target, weight, alpha, beta, size_average=True)
    assert jnp.allclose(out, ref, atol=1e-5, rtol=1e-5), "weighted mean mismatch"

    # --- test 2: no weight, sum reduction ---
    loss_fn_sum = WeightedBCEWithLogitsLoss(size_average=False)
    out2 = loss_fn_sum(logits, target, None, alpha, beta)
    jax.block_until_ready(out2)
    ref2 = _reference(logits, target, None, alpha, beta, size_average=False)
    assert jnp.allclose(out2, ref2, atol=1e-4, rtol=1e-5), "unweighted sum mismatch"

    # --- test 3: odd shape exercising the padded-tail mask path ---
    shape3 = (3, 5, 7)
    logits3 = jax.random.normal(k4, shape3, dtype=jnp.float32)
    target3 = (jax.random.uniform(k5, shape3) > 0.5).astype(jnp.float32)
    weight3 = jax.random.uniform(k6, shape3, dtype=jnp.float32)
    out3 = loss_fn(logits3, target3, weight3, alpha, beta)
    jax.block_until_ready(out3)
    ref3 = _reference(logits3, target3, weight3, alpha, beta, size_average=True)
    assert jnp.allclose(out3, ref3, atol=1e-5, rtol=1e-5), "masked-tail mismatch"

    print("KERNEL_OK")
</pallas_src>

<mosaic_0001>
module attributes {stable_mosaic.version = 11 : i64} {
  func.func @_wbce_kernel(%arg0: i32, %arg1: memref<2xf32, #tpu.memory_space<smem>>, %arg2: memref<16x128xf32, #tpu.memory_space<vmem>>, %arg3: memref<16x128xf32, #tpu.memory_space<vmem>>, %arg4: memref<16x128xf32, #tpu.memory_space<vmem>>, %arg5: memref<1x1x1xf32, #tpu.memory_space<vmem>>) attributes {dimension_semantics = [#tpu.dimension_semantics<parallel>], iteration_bounds = array<i64: 1>, scalar_prefetch = 0 : i64, scratch_operands = 0 : i64, tpu.core_type = #tpu.core_type<tc>, window_params = [{transform_indices = @transform_0, window_bounds = array<i64: 2>}, {transform_indices = @transform_1, window_bounds = array<i64: 16, 128>}, {transform_indices = @transform_2, window_bounds = array<i64: 16, 128>}, {transform_indices = @transform_3, window_bounds = array<i64: 16, 128>}, {transform_indices = @transform_4, window_bounds = array<i64: 1, 1, 1>}]} {
    %c0 = arith.constant 0 : index
    %c0_0 = arith.constant 0 : index
    %0 = vector.load %arg2[%c0, %c0_0] : memref<16x128xf32, #tpu.memory_space<vmem>>, vector<16x128xf32>
    %c0_1 = arith.constant 0 : index
    %c0_2 = arith.constant 0 : index
    %1 = vector.load %arg3[%c0_1, %c0_2] : memref<16x128xf32, #tpu.memory_space<vmem>>, vector<16x128xf32>
    %cst = arith.constant 0.000000e+00 : f32
    %2 = vector.broadcast %cst : f32 to vector<16x128xf32>
    %3 = arith.subf %2, %0 : vector<16x128xf32>
    %cst_3 = arith.constant 0.000000e+00 : f32
    %4 = vector.broadcast %cst_3 : f32 to vector<16x128xf32>
    %5 = arith.maximumf %3, %4 : vector<16x128xf32>
    %6 = arith.mulf %0, %1 : vector<16x128xf32>
    %7 = arith.subf %0, %6 : vector<16x128xf32>
    %8 = arith.addf %7, %5 : vector<16x128xf32>
    %cst_4 = arith.constant 0.000000e+00 : f32
    %9 = vector.broadcast %cst_4 : f32 to vector<16x128xf32>
    %10 = arith.subf %9, %5 : vector<16x128xf32>
    %11 = math.exp %10 : vector<16x128xf32>
    %cst_5 = arith.constant 0.000000e+00 : f32
    %12 = vector.broadcast %cst_5 : f32 to vector<16x128xf32>
    %13 = arith.subf %12, %0 : vector<16x128xf32>
    %14 = arith.subf %13, %5 : vector<16x128xf32>
    %15 = math.exp %14 : vector<16x128xf32>
    %16 = arith.addf %11, %15 : vector<16x128xf32>
    %17 = math.log %16 : vector<16x128xf32>
    %18 = arith.addf %8, %17 : vector<16x128xf32>
    %c0_6 = arith.constant 0 : index
    %19 = memref.load %arg1[%c0_6] : memref<2xf32, #tpu.memory_space<smem>>
    %c1 = arith.constant 1 : index
    %20 = memref.load %arg1[%c1] : memref<2xf32, #tpu.memory_space<smem>>
    %21 = vector.broadcast %19 : f32 to vector<16x128xf32>
    %22 = arith.mulf %21, %18 : vector<16x128xf32>
    %23 = vector.broadcast %20 : f32 to vector<16x128xf32>
    %24 = arith.mulf %23, %18 : vector<16x128xf32>
    %c0_7 = arith.constant 0 : index
    %c0_8 = arith.constant 0 : index
    %25 = vector.load %arg4[%c0_7, %c0_8] : memref<16x128xf32, #tpu.memory_space<vmem>>, vector<16x128xf32>
    %26 = arith.mulf %24, %25 : vector<16x128xf32>
    %27 = arith.addf %22, %26 : vector<16x128xf32>
    %28 = vector.shape_cast %27 : vector<16x128xf32> to vector<1x16x128xf32>
    %cst_9 = arith.constant dense<0.000000e+00> : vector<1xf32>
    %29 = vector.multi_reduction <add>, %28, %cst_9 [1, 2] : vector<1x16x128xf32> to vector<1xf32>
    %30 = vector.shape_cast %29 : vector<1xf32> to vector<1x1x1xf32>
    %31 = vector.extract %30[0, 0, 0] : f32 from vector<1x1x1xf32>
    %32 = vector.broadcast %31 : f32 to vector<1x1xf32>
    %33 = vector.shape_cast %32 : vector<1x1xf32> to vector<1x1x1xf32>
    %c0_10 = arith.constant 0 : index
    %c0_11 = arith.constant 0 : index
    %c0_12 = arith.constant 0 : index
    %34 = vector.load %arg5[%c0_10, %c0_11, %c0_12] : memref<1x1x1xf32, #tpu.memory_space<vmem>>, vector<1x1x1xf32>
    tpu.vector_store %arg5[%c0_10, %c0_11, %c0_12], %33 {strides = array<i32>} : memref<1x1x1xf32, #tpu.memory_space<vmem>>, vector<1x1x1xf32>,
    return
  }
  func.func @transform_0(%arg0: i32) -> i32 {
    %c0_i32 = arith.constant 0 : i32
    %c0_i32_0 = arith.constant 0 : i32
    return %c0_i32 : i32
  }
  func.func @transform_1(%arg0: i32) -> (i32, i32) {
    %c0_i32 = arith.constant 0 : i32
    %c0_i32_0 = arith.constant 0 : i32
    return %arg0, %c0_i32 : i32, i32
  }
  func.func @transform_2(%arg0: i32) -> (i32, i32) {
    %c0_i32 = arith.constant 0 : i32
    %c0_i32_0 = arith.constant 0 : i32
    return %arg0, %c0_i32 : i32, i32
  }
  func.func @transform_3(%arg0: i32) -> (i32, i32) {
    %c0_i32 = arith.constant 0 : i32
    %c0_i32_0 = arith.constant 0 : i32
    return %arg0, %c0_i32 : i32, i32
  }
  func.func @transform_4(%arg0: i32) -> (i32, i32, i32) {
    %c0_i32 = arith.constant 0 : i32
    %c0_i32_0 = arith.constant 0 : i32
    %c0_i32_1 = arith.constant 0 : i32
    return %arg0, %c0_i32, %c0_i32_0 : i32, i32, i32
  }
}

</mosaic_0001>

<bundles_post_ra>
// kernel: tpu_custom_call.1
= control target key start
LH: loop header
LB: loop body
LE: loop exit
PB: predicated region body
PF: predicated region fallthrough
CT: control target
= control target key end

     0   :  { %9 = vsyncpa [#allocation5], 0  ;;  %s343_s0 = inlined_call_operand.hbm [shape: f32[2], index: 0, kind: input, shape index: {}]   ;;  %s344_s1 = inlined_call_operand.hbm [shape: f32[16,128], index: 1, kind: input, shape index: {}]   ;;  %s345_s2 = inlined_call_operand.hbm [shape: f32[16,128], index: 2, kind: input, shape index: {}]   ;;  %s346_s3 = inlined_call_operand.hbm [shape: f32[16,128], index: 3, kind: input, shape index: {}]   ;;  %s347_s4 = inlined_call_operand.hbm [shape: f32[1,1,1], index: 4, kind: output, shape index: {}]  }
   0x1   :  { %10 = vsyncpa [#allocation3], 0 }
   0x2   :  { %11 = vsyncpa [#allocation8], 0 }
   0x3   :  { %12 = vsyncpa [#allocation4], 0  ;;  %s39_s17 = sshll.u32 %s345_s2, 4  ;;  %s296_s18 = smov [#allocation7]   ;;  %s40_s17 = int_to_ptr.hbm [resolvable:$true] %s39_s17 }
   0x4   :  { %s41_s19 = sshll.u32 %s296_s18, 4  ;;  %s18_s22 = sshll.u32 %s343_s0, 4  ;;  %s42_s19 = int_to_ptr.vmem [resolvable:$true] %s41_s19  ;;  %s19_s22 = int_to_ptr.hbm [resolvable:$true] %s18_s22 }
   0x5   :  { %s297_s23 = smov 128   ;;  %s298_s24 = smov 8  }
   0x6   :  { %47 = dma.hbm_to_vmem [thread:$0]  %s40_s17, 256, %s42_s19, [#allocation8], %s297_s23, %s297_s23, %s298_s24  }
   0x7   :  { %s299_s25 = smov [#allocation2]   ;;  %s26_s28 = sshll.u32 %s344_s1, 4  ;;  %s27_s28 = int_to_ptr.hbm [resolvable:$true] %s26_s28 }
   0x8   :  { %21 = dma.hbm_to_smem %s19_s22, 16, %s299_s25, [#allocation5]  }
   0x9   :  { %s300_s2 = smov [#allocation6]   ;;  %s52_s6 = sshll.u32 %s346_s3, 4  ;;  %s53_s6 = int_to_ptr.hbm [resolvable:$true] %s52_s6 }
   0xa   :  { %s28_s29 = sshll.u32 %s300_s2, 4  ;;  %s301_s0 = smov [#allocation9]   ;;  %s29_s29 = int_to_ptr.vmem [resolvable:$true] %s28_s29 }
   0xb   :  { %34 = dma.hbm_to_vmem [thread:$0]  %s27_s28, 256, %s29_s29, [#allocation3], %s297_s23, %s297_s23, %s298_s24  }
   0xc   :  { %s54_s7 = sshll.u32 %s301_s0, 4  ;;  %s55_s7 = int_to_ptr.vmem [resolvable:$true] %s54_s7 }
   0xd   :  { %60 = dma.hbm_to_vmem [thread:$0]  %s53_s6, 256, %s55_s7, [#allocation8], %s297_s23, %s297_s23, %s298_s24  }
   0xe   :  { %288 = dma.done.wait [#allocation5], 16  }
   0xf   :  { %289 = vsyncadd [#allocation5], 4294967280 }
  0x10   :  { %290 = dma.done.wait [#allocation3], 256  }
  0x11   :  { %291 = vsyncadd [#allocation3], 4294967040 }
  0x12   :  { %292 = dma.done.wait [#allocation8], 512  }
  0x13   :  { %293 = vsyncadd [#allocation8], 4294966784 }
  0x14   :  { %77 = sfence }
  0x15   :  { %v78_v0 = vld [vmem:[#allocation6] sm:$0xff]  ;;  %v79_v1 = vld [vmem:[#allocation6 + $0x8] sm:$0xff]  ;;  %v80_v14 = vld [vmem:[#allocation7] sm:$0xff]  ;;  %s112_s1 = sld [smem:[#allocation2]]  ;;  %s302_s8 = smov [#allocation10]   ;;  %vm137_vm0 = vcmask 0  }
  0x16   :  { %v82_v2 = vsub.f32 0.0, %v78_v0  ;;  %v83_v3 = vsub.f32 0.0, %v79_v1  ;;  %v81_v16 = vld [vmem:[#allocation7 + $0x8] sm:$0xff]  ;;  %v86_v19 = vmul.f32 %v80_v14, %v78_v0  ;;  %s158_s3 = sld [smem:[#allocation2 + $0x1]]  ;;  %v120_v36 = vld [vmem:[#allocation9] sm:$0xff]  ;;  %v121_v39 = vld [vmem:[#allocation9 + $0x8] sm:$0xff] }
  0x17   :  { %v87_v21 = vmul.f32 %v81_v16, %v79_v1  ;;  %s144_s9 = sshll.u32 %s302_s8, 4  ;;  %s146_s12 = sshll.u32 %s347_s4, 4  ;;  %s145_s9 = int_to_ptr.vmem [resolvable:$true] %s144_s9  ;;  %s147_s12 = int_to_ptr.hbm [resolvable:$true] %s146_s12 }
  0x18   :  { %v84_v4 = vmax.f32 %v82_v2, 0.0  ;;  %v85_v5 = vmax.f32 %v83_v3, 0.0  ;;  %v88_v24 = vsub.f32 %v78_v0, %v86_v19 }
  0x19   :  { %v89_v25 = vsub.f32 %v79_v1, %v87_v21 }
  0x1a   :  { %v92_v6 = vsub.f32 0.0, %v84_v4  ;;  %v93_v7 = vsub.f32 0.0, %v85_v5  ;;  %v98_v8 = vsub.f32 %v82_v2, %v84_v4  ;;  %v99_v9 = vsub.f32 %v83_v3, %v85_v5 }
  0x1b   :  { %v90_v26 = vadd.f32 %v88_v24, %v84_v4  ;;  %v91_v28 = vadd.f32 %v89_v25, %v85_v5  ;;  %v114_v32 = vstv %s112_s1 }
  0x1c   :  { %v94_v10 = vmul.f32 1.442695, %v92_v6  ;;  %v96_v11 = vmul.f32 1.442695, %v93_v7  ;;  %v100_v12 = vmul.f32 1.442695, %v98_v8  ;;  %v117_v33 = vstv %s158_s3 }
  0x1d   :  { %v102_v13 = vmul.f32 1.442695, %v99_v9 }
  0x1e   :  { %168 = vpow2.f32 %v94_v10 }
  0x1f   :  { %170 = vpow2.f32 %v96_v11 }
  0x20   :  { %172 = vpow2.f32 %v100_v12 }
  0x21   :  { %174 = vpow2.f32 %v102_v13 }
  0x24   :  { %v169_v15 = vpop.eup %168 }
  0x25   :  { %v171_v17 = vpop.eup %170 }
  0x26   :  { %v173_v18 = vpop.eup %172 }
  0x27   :  { %v175_v20 = vpop.eup %174  ;;  %v104_v22 = vadd.f32 %v173_v18, %v169_v15 }
  0x28   :  { %v105_v23 = vadd.f32 %v175_v20, %v171_v17 }
  0x29   :  { %176 = vlog2.f32 %v104_v22 }
  0x2a   :  { %178 = vlog2.f32 %v105_v23 }
  0x2f   :  { %v177_v27 = vpop.eup %176 }
  0x30   :  { %v179_v29 = vpop.eup %178  ;;  %v107_v30 = vmul.f32 0.6931472, %v177_v27 }
  0x31   :  { %v109_v31 = vmul.f32 0.6931472, %v179_v29 }
  0x32   :  { %v110_v34 = vadd.f32 %v107_v30, %v90_v26 }
  0x33   :  { %v111_v35 = vadd.f32 %v109_v31, %v91_v28 }
  0x34   :  { %v115_v37 = vmul.f32 %v114_v32, %v110_v34  ;;  %v118_v38 = vmul.f32 %v117_v33, %v110_v34 }
  0x35   :  { %v116_v40 = vmul.f32 %v114_v32, %v111_v35  ;;  %v119_v41 = vmul.f32 %v117_v33, %v111_v35 }
  0x36   :  { %v122_v42 = vmul.f32 %v120_v36, %v118_v38 }
  0x37   :  { %v123_v43 = vmul.f32 %v121_v39, %v119_v41 }
  0x38   :  { %v124_v44 = vadd.f32 %v122_v42, %v115_v37 }
  0x39   :  { %v125_v45 = vadd.f32 %v123_v43, %v116_v40 }
  0x3b   :  { %v126_v46 = vadd.f32 %v125_v45, %v124_v44 }
  0x3d   :  { %127 = vadd.xlane.f32.xlu0 %v126_v46 }
  0xb0   :  { %v128_v47 = vpop.xlane.xlu0 %127 }
  0xb1   :  { %v129_v48 = vrot.slane %v128_v47, 4 }
  0xb3   :  { %v130_v49 = vadd.f32 %v129_v48, %v128_v47 }
  0xb5   :  { %v131_v50 = vrot.slane %v130_v49, 2 }
  0xb7   :  { %v132_v51 = vadd.f32 %v131_v50, %v130_v49 }
  0xb9   :  { %v133_v52 = vrot.slane %v132_v51, 1 }
  0xbb   :  { %v134_v53 = vadd.f32 %v133_v52, %v132_v51 }
  0xbd   :  { %159 = vpush %v134_v53 }
  0xee   :  { %s160_s13 = spop %159 }
  0xef   :  { %v136_v54 = vstv %s160_s13 }
  0xf0   :  { %138 = vst.msk [vmem:[#allocation10] sm:$0x1] %vm137_vm0, %v136_v54 }
  0xf1   :  { %149 = dma.vmem_to_hbm [thread:$0]  %s145_s9, 16, %s147_s12, [#allocation4]  }
  0xf2   :  { %294 = dma.done.wait [#allocation4], 16  }
  0xf3   :  { %295 = vsyncadd [#allocation4], 4294967280 }
  0xf4   :  { %154 = vsyncpa [#allocation3], 1 }
  0xf5   :  { %155 = vsyncpa [#allocation8], 1 }
  0xf6   :  { %156 = vsyncpa [#allocation4], 1 }
  0xf7   :  { %157 = vsyncpa [#allocation5], 1 }

</bundles_post_ra>
